<compile_context>
chip_gen: v7x
topology: tpu7x:2x2x1
jax: 0.10.0
libtpu: 0.0.40
codegen_flags: <defaults>
</compile_context>

<pallas_src>
import math

import jax
import jax.numpy as jnp
from jax.experimental import pallas as pl
from jax.experimental.pallas import tpu as pltpu


def _gelu_exact(x):
    # PyTorch F.gelu default = exact (erf) GELU.
    inv_sqrt2 = jnp.float32(1.0 / math.sqrt(2.0))
    return 0.5 * x * (1.0 + jax.lax.erf(x * inv_sqrt2))


def _mlp_kernel(attr_ref, w_in_ref, b_in_ref,
                w_mid_ref, b_mid_ref,
                w_out_ref, b_out_ref,
                out_ref):
    # attr_ref : (TB, D_in) tile of the flattened attributes.
    # Matmul operands use the weights' dtype (f32 or bf16); accumulation,
    # bias-add and GELU stay in f32.
    cdt = w_in_ref.dtype
    x = attr_ref[...].astype(cdt)

    # proj_in + gelu
    h = jnp.dot(x, w_in_ref[...], preferred_element_type=jnp.float32)
    h = _gelu_exact(h + b_in_ref[...].astype(jnp.float32))

    # proj_mid + gelu
    h = jnp.dot(h.astype(cdt), w_mid_ref[...], preferred_element_type=jnp.float32)
    h = _gelu_exact(h + b_mid_ref[...].astype(jnp.float32))

    # proj_out — computed once per batch row; length expansion happens outside.
    o = jnp.dot(h.astype(cdt), w_out_ref[...], preferred_element_type=jnp.float32)
    o = o + b_out_ref[...].astype(jnp.float32)
    out_ref[...] = o.astype(out_ref.dtype)


def _round_up(x, m):
    return ((x + m - 1) // m) * m


def _choose_tiling(B, *, max_tile=512, prefer_even_tiles=True):
    """Pick (TB, n_tiles, B_pad).

    TB is a multiple of 8 (f32 sublane) and capped at `max_tile`; padding is
    at most 7 rows per tile.  When B >= 16 the tile count is made even so the
    'parallel' batch axis can shard across both v7x TensorCores (harmless on
    single-TC v5e/v6e).
    """
    n_tiles = max(1, -(-B // max_tile))
    if prefer_even_tiles and B >= 16 and n_tiles % 2 == 1:
        n_tiles += 1
    TB = _round_up(-(-B // n_tiles), 8)
    B_pad = TB * n_tiles
    return TB, n_tiles, B_pad


def attr_projector_forward(attr, length, params, *,
                           use_bf16_matmul=False,
                           expand_length=True):
    """attr: (B, n_attrs, dim_in) float32.

    Returns (B, length, dim_out) float32 (PyTorch semantics), or the
    (B, dim_out) per-row result if expand_length=False (the length axis is a
    pure broadcast; skipping it avoids the dominant HBM writeback when a
    consumer can use the rows directly).
    """
    B, n_attrs, dim_in = attr.shape
    w_in, b_in, w_mid, b_mid, w_out, b_out = params
    D_in = n_attrs * dim_in
    dim_hid = w_in.shape[1]
    dim_out = w_out.shape[1]

    attr_flat = attr.reshape(B, D_in)            # glue reshape in plain JAX

    if use_bf16_matmul:
        # bf16 operands, f32 accumulation (v6e/v7x MXU path). Loosens
        # agreement with the f32 reference to ~1e-2.
        w_in_k, w_mid_k, w_out_k = (w.astype(jnp.bfloat16) for w in (w_in, w_mid, w_out))
    else:
        w_in_k, w_mid_k, w_out_k = w_in, w_mid, w_out

    TB, n_tiles, B_pad = _choose_tiling(B)
    if B_pad != B:
        attr_flat = jnp.pad(attr_flat, ((0, B_pad - B), (0, 0)))

    cost = pl.CostEstimate(
        flops=2 * B_pad * (D_in * dim_hid + dim_hid * dim_hid + dim_hid * dim_out),
        transcendentals=2 * B_pad * dim_hid,
        bytes_accessed=4 * (B_pad * D_in
                            + D_in * dim_hid + dim_hid
                            + dim_hid * dim_hid + dim_hid
                            + dim_hid * dim_out + dim_out
                            + B_pad * dim_out),
    )

    out2d = pl.pallas_call(
        _mlp_kernel,
        out_shape=jax.ShapeDtypeStruct((B_pad, dim_out), jnp.float32),
        grid=(n_tiles,),
        in_specs=[
            pl.BlockSpec((TB, D_in),         lambda i: (i, 0)),
            pl.BlockSpec((D_in, dim_hid),    lambda i: (0, 0)),
            pl.BlockSpec((1, dim_hid),       lambda i: (0, 0)),
            pl.BlockSpec((dim_hid, dim_hid), lambda i: (0, 0)),
            pl.BlockSpec((1, dim_hid),       lambda i: (0, 0)),
            pl.BlockSpec((dim_hid, dim_out), lambda i: (0, 0)),
            pl.BlockSpec((1, dim_out),       lambda i: (0, 0)),
        ],
        out_specs=pl.BlockSpec((TB, dim_out), lambda i: (i, 0)),
        compiler_params=pltpu.CompilerParams(
            dimension_semantics=("parallel",)),
        cost_estimate=cost,
    )(attr_flat, w_in_k, b_in, w_mid_k, b_mid, w_out_k, b_out)

    out2d = out2d[:B]
    if not expand_length:
        return out2d
    # Length expansion is mathematically a pure broadcast of the per-row MLP
    # output; do it outside the kernel so the kernel writeback stays (B, dim_out).
    return jnp.broadcast_to(out2d[:, None, :], (B, length, dim_out))


def init_params(key, n_attrs, dim_in, dim_hid, dim_out):
    """Deterministic PyTorch-Linear-style init. Weights stored as (in, out)."""
    D_in = n_attrs * dim_in
    ks = jax.random.split(key, 6)

    def linear(kw, kb, fan_in, fan_out):
        bound = 1.0 / math.sqrt(fan_in)
        w = jax.random.uniform(kw, (fan_in, fan_out), jnp.float32, -bound, bound)
        b = jax.random.uniform(kb, (1, fan_out), jnp.float32, -bound, bound)
        return w, b

    w_in, b_in = linear(ks[0], ks[1], D_in, dim_hid)
    w_mid, b_mid = linear(ks[2], ks[3], dim_hid, dim_hid)
    w_out, b_out = linear(ks[4], ks[5], dim_hid, dim_out)
    return (w_in, b_in, w_mid, b_mid, w_out, b_out)


def _reference_forward(attr, length, params):
    """Plain-JAX reference for correctness checking."""
    w_in, b_in, w_mid, b_mid, w_out, b_out = params
    B = attr.shape[0]
    x = attr.reshape(B, -1)
    h = _gelu_exact(x @ w_in + b_in)
    h = _gelu_exact(h @ w_mid + b_mid)
    o = h @ w_out + b_out
    return jnp.broadcast_to(o[:, None, :], (B, length, o.shape[-1]))


if __name__ == "__main__":
    # Small shapes consistent with the module defaults
    # (n_attrs=3, dim_in=dim_hid=dim_out=128). B=24 so the adaptive tiling
    # picks 2 tiles of 16 rows and the pipeline / parallel semantics are
    # exercised (with only 8 padded rows).
    B, n_attrs, dim_in, dim_hid, dim_out, length = 24, 3, 128, 128, 128, 12

    key = jax.random.PRNGKey(0)
    k_attr, k_params = jax.random.split(key)

    attr = jax.random.normal(k_attr, (B, n_attrs, dim_in), jnp.float32)
    params = init_params(k_params, n_attrs, dim_in, dim_hid, dim_out)

    out = attr_projector_forward(attr, length, params)
    out = jax.block_until_ready(out)

    ref = jax.block_until_ready(_reference_forward(attr, length, params))
    assert out.shape == (B, length, dim_out)
    assert jnp.allclose(out, ref, rtol=1e-4, atol=1e-4)

    # TODO(synk): self.attns (MultiheadAttention stack) is constructed but
    # never used in forward(), so it is intentionally not implemented.

    print("KERNEL_OK")
</pallas_src>

<mosaic_0001>
module attributes {stable_mosaic.version = 11 : i64} {
  func.func @_mlp_kernel(%arg0: i32, %arg1: memref<16x384xf32, #tpu.memory_space<vmem>>, %arg2: memref<384x128xf32, #tpu.memory_space<vmem>>, %arg3: memref<1x128xf32, #tpu.memory_space<vmem>>, %arg4: memref<128x128xf32, #tpu.memory_space<vmem>>, %arg5: memref<1x128xf32, #tpu.memory_space<vmem>>, %arg6: memref<128x128xf32, #tpu.memory_space<vmem>>, %arg7: memref<1x128xf32, #tpu.memory_space<vmem>>, %arg8: memref<16x128xf32, #tpu.memory_space<vmem>>) attributes {dimension_semantics = [#tpu.dimension_semantics<parallel>], iteration_bounds = array<i64: 2>, scalar_prefetch = 0 : i64, scratch_operands = 0 : i64, tpu.core_type = #tpu.core_type<tc>, window_params = [{transform_indices = @transform_0, window_bounds = array<i64: 16, 384>}, {pipeline_mode = #tpu.pipeline_mode<synchronous>, transform_indices = @transform_1, window_bounds = array<i64: 384, 128>}, {pipeline_mode = #tpu.pipeline_mode<synchronous>, transform_indices = @transform_2, window_bounds = array<i64: 1, 128>}, {pipeline_mode = #tpu.pipeline_mode<synchronous>, transform_indices = @transform_3, window_bounds = array<i64: 128, 128>}, {pipeline_mode = #tpu.pipeline_mode<synchronous>, transform_indices = @transform_4, window_bounds = array<i64: 1, 128>}, {pipeline_mode = #tpu.pipeline_mode<synchronous>, transform_indices = @transform_5, window_bounds = array<i64: 128, 128>}, {pipeline_mode = #tpu.pipeline_mode<synchronous>, transform_indices = @transform_6, window_bounds = array<i64: 1, 128>}, {transform_indices = @transform_7, window_bounds = array<i64: 16, 128>}]} {
    %c0 = arith.constant 0 : index
    %c0_0 = arith.constant 0 : index
    %0 = vector.load %arg1[%c0, %c0_0] : memref<16x384xf32, #tpu.memory_space<vmem>>, vector<16x384xf32>
    %c0_1 = arith.constant 0 : index
    %c0_2 = arith.constant 0 : index
    %1 = vector.load %arg2[%c0_1, %c0_2] : memref<384x128xf32, #tpu.memory_space<vmem>>, vector<384x128xf32>
    %cst = arith.constant dense<0.000000e+00> : vector<16x128xf32>
    %2 = tpu.matmul %0, %1, %cst {dimension_numbers = #tpu.dot_dimension_numbers<[1], [0], [0], [1], [0, 0, 1, 1], [], []>} : vector<16x384xf32>, vector<384x128xf32>, vector<16x128xf32> -> vector<16x128xf32>
    %c0_3 = arith.constant 0 : index
    %c0_4 = arith.constant 0 : index
    %3 = vector.load %arg3[%c0_3, %c0_4] : memref<1x128xf32, #tpu.memory_space<vmem>>, vector<1x128xf32>
    %4 = vector.broadcast %3 : vector<1x128xf32> to vector<16x128xf32>
    %5 = arith.addf %2, %4 : vector<16x128xf32>
    %cst_5 = arith.constant 5.000000e-01 : f32
    %6 = vector.broadcast %cst_5 : f32 to vector<16x128xf32>
    %7 = arith.mulf %6, %5 : vector<16x128xf32>
    %cst_6 = arith.constant 0.707106769 : f32
    %8 = vector.broadcast %cst_6 : f32 to vector<16x128xf32>
    %9 = arith.mulf %5, %8 : vector<16x128xf32>
    %10 = math.erf %9 : vector<16x128xf32>
    %cst_7 = arith.constant 1.000000e+00 : f32
    %11 = vector.broadcast %cst_7 : f32 to vector<16x128xf32>
    %12 = arith.addf %11, %10 : vector<16x128xf32>
    %13 = arith.mulf %7, %12 : vector<16x128xf32>
    %c0_8 = arith.constant 0 : index
    %c0_9 = arith.constant 0 : index
    %14 = vector.load %arg4[%c0_8, %c0_9] : memref<128x128xf32, #tpu.memory_space<vmem>>, vector<128x128xf32>
    %cst_10 = arith.constant dense<0.000000e+00> : vector<16x128xf32>
    %15 = tpu.matmul %13, %14, %cst_10 {dimension_numbers = #tpu.dot_dimension_numbers<[1], [0], [0], [1], [0, 0, 1, 1], [], []>} : vector<16x128xf32>, vector<128x128xf32>, vector<16x128xf32> -> vector<16x128xf32>
    %c0_11 = arith.constant 0 : index
    %c0_12 = arith.constant 0 : index
    %16 = vector.load %arg5[%c0_11, %c0_12] : memref<1x128xf32, #tpu.memory_space<vmem>>, vector<1x128xf32>
    %17 = vector.broadcast %16 : vector<1x128xf32> to vector<16x128xf32>
    %18 = arith.addf %15, %17 : vector<16x128xf32>
    %cst_13 = arith.constant 5.000000e-01 : f32
    %19 = vector.broadcast %cst_13 : f32 to vector<16x128xf32>
    %20 = arith.mulf %19, %18 : vector<16x128xf32>
    %cst_14 = arith.constant 0.707106769 : f32
    %21 = vector.broadcast %cst_14 : f32 to vector<16x128xf32>
    %22 = arith.mulf %18, %21 : vector<16x128xf32>
    %23 = math.erf %22 : vector<16x128xf32>
    %cst_15 = arith.constant 1.000000e+00 : f32
    %24 = vector.broadcast %cst_15 : f32 to vector<16x128xf32>
    %25 = arith.addf %24, %23 : vector<16x128xf32>
    %26 = arith.mulf %20, %25 : vector<16x128xf32>
    %c0_16 = arith.constant 0 : index
    %c0_17 = arith.constant 0 : index
    %27 = vector.load %arg6[%c0_16, %c0_17] : memref<128x128xf32, #tpu.memory_space<vmem>>, vector<128x128xf32>
    %cst_18 = arith.constant dense<0.000000e+00> : vector<16x128xf32>
    %28 = tpu.matmul %26, %27, %cst_18 {dimension_numbers = #tpu.dot_dimension_numbers<[1], [0], [0], [1], [0, 0, 1, 1], [], []>} : vector<16x128xf32>, vector<128x128xf32>, vector<16x128xf32> -> vector<16x128xf32>
    %c0_19 = arith.constant 0 : index
    %c0_20 = arith.constant 0 : index
    %29 = vector.load %arg7[%c0_19, %c0_20] : memref<1x128xf32, #tpu.memory_space<vmem>>, vector<1x128xf32>
    %30 = vector.broadcast %29 : vector<1x128xf32> to vector<16x128xf32>
    %31 = arith.addf %28, %30 : vector<16x128xf32>
    %c0_21 = arith.constant 0 : index
    %c0_22 = arith.constant 0 : index
    %32 = vector.load %arg8[%c0_21, %c0_22] : memref<16x128xf32, #tpu.memory_space<vmem>>, vector<16x128xf32>
    tpu.vector_store %arg8[%c0_21, %c0_22], %31 {strides = array<i32>} : memref<16x128xf32, #tpu.memory_space<vmem>>, vector<16x128xf32>,
    return
  }
  func.func @transform_0(%arg0: i32) -> (i32, i32) {
    %c0_i32 = arith.constant 0 : i32
    %c0_i32_0 = arith.constant 0 : i32
    return %arg0, %c0_i32 : i32, i32
  }
  func.func @transform_1(%arg0: i32) -> (i32, i32) {
    %c0_i32 = arith.constant 0 : i32
    %c0_i32_0 = arith.constant 0 : i32
    %c0_i32_1 = arith.constant 0 : i32
    return %c0_i32, %c0_i32_0 : i32, i32
  }
  func.func @transform_2(%arg0: i32) -> (i32, i32) {
    %c0_i32 = arith.constant 0 : i32
    %c0_i32_0 = arith.constant 0 : i32
    %c0_i32_1 = arith.constant 0 : i32
    return %c0_i32, %c0_i32_0 : i32, i32
  }
  func.func @transform_3(%arg0: i32) -> (i32, i32) {
    %c0_i32 = arith.constant 0 : i32
    %c0_i32_0 = arith.constant 0 : i32
    %c0_i32_1 = arith.constant 0 : i32
    return %c0_i32, %c0_i32_0 : i32, i32
  }
  func.func @transform_4(%arg0: i32) -> (i32, i32) {
    %c0_i32 = arith.constant 0 : i32
    %c0_i32_0 = arith.constant 0 : i32
    %c0_i32_1 = arith.constant 0 : i32
    return %c0_i32, %c0_i32_0 : i32, i32
  }
  func.func @transform_5(%arg0: i32) -> (i32, i32) {
    %c0_i32 = arith.constant 0 : i32
    %c0_i32_0 = arith.constant 0 : i32
    %c0_i32_1 = arith.constant 0 : i32
    return %c0_i32, %c0_i32_0 : i32, i32
  }
  func.func @transform_6(%arg0: i32) -> (i32, i32) {
    %c0_i32 = arith.constant 0 : i32
    %c0_i32_0 = arith.constant 0 : i32
    %c0_i32_1 = arith.constant 0 : i32
    return %c0_i32, %c0_i32_0 : i32, i32
  }
  func.func @transform_7(%arg0: i32) -> (i32, i32) {
    %c0_i32 = arith.constant 0 : i32
    %c0_i32_0 = arith.constant 0 : i32
    return %arg0, %c0_i32 : i32, i32
  }
}

</mosaic_0001>

<bundles_post_ra>
// kernel: tpu_custom_call.1
= control target key start
LH: loop header
LB: loop body
LE: loop exit
PB: predicated region body
PF: predicated region fallthrough
CT: control target
= control target key end

     0   :  { %12 = vsyncpa [#allocation3], 0  ;;  %s1858_s0 = inlined_call_operand.hbm [shape: f32[32,384], index: 0, kind: input, shape index: {}]   ;;  %s1859_s1 = inlined_call_operand.hbm [shape: f32[384,128], index: 1, kind: input, shape index: {}]   ;;  %s1860_s2 = inlined_call_operand.vmem [shape: f32[1,128], index: 2, kind: input, shape index: {}]   ;;  %s1861_s3 = inlined_call_operand.hbm [shape: f32[128,128], index: 3, kind: input, shape index: {}]   ;;  %s1862_s4 = inlined_call_operand.vmem [shape: f32[1,128], index: 4, kind: input, shape index: {}]   ;;  %s1863_s5 = inlined_call_operand.hbm [shape: f32[128,128], index: 5, kind: input, shape index: {}]   ;;  %s1864_s6 = inlined_call_operand.vmem [shape: f32[1,128], index: 6, kind: input, shape index: {}]   ;;  %s1865_s7 = inlined_call_operand.hbm [shape: f32[32,128], index: 7, kind: output, shape index: {}]  }
   0x1   :  { %14 = vsyncpa [#allocation3 + $0x1], 0 }
   0x2   :  { %15 = vsyncpa [#allocation6], 0 }
   0x3   :  { %16 = vsyncpa [#allocation9], 0 }
   0x4   :  { %17 = vsyncpa [#allocation4], 0 }
   0x5   :  { %19 = vsyncpa [#allocation4 + $0x1], 0  ;;  %s1572_s24 = smov 0   ;;  %s1574_s25 = smov 0  }
   0x6   :  { %s1576_s26 = smov 0   ;;  %s1578_s27 = smov 0  }
   0x7 LB: > { %s1593_s28 = sadd.s32 4294967295, %s1519_s27   ;;  %s889_s29 = sadd.s32 4294967294, %s1519_s27   ;;  %s1519_s27 = sphi %s1578_s27, %s1891_s27   ;;  %s1515_s26 = sphi %s1576_s26, %s1890_s26   ;;  %s1511_s25 = sphi %s1574_s25, %s1889_s25   ;;  %s1507_s24 = sphi %s1572_s24, %s1888_s24  }
   0x8   : > { %p45_p0 = scmp.ne.s32.totalorder %s1511_s25, %s1507_s24  ;;  %p1866_p1 = scmp.eq.s32.totalorder %s1593_s28, 0 }
   0x9   : > { %p201_p3 = scmp.eq.s32.totalorder %s889_s29, 1  ;;  %p890_p5 = scmp.ge.s32.totalorder %s1519_s27, 1 }
   0xa   : > { %p1602_p4 = por %p1866_p1, %p45_p0  ;;  %p208_p7 = scmp.lt.s32.totalorder %s1519_s27, 3 }
   0xb   : > { %p1607_p6 = por %p201_p3, %p45_p0  ;;  %s1521_s10 = smov [#allocation5]  }
   0xc   : > { %s1870_s30 = scalar_select %p1602_p4, 1, 0 }
   0xd   : > { %s1871_s8 = scalar_select %p1607_p6, 1, 0 }
   0xe   : > { %p1612_p8 = pnand %p890_p5, %p208_p7  ;;  %s220_s11 = sshll.u32 %s1521_s10, 4  ;;  %s1616_s11 = int_to_ptr.vmem [resolvable:$true] %s220_s11 }
   0xf   : > { %1872 = sst [smem:[#allocation15_spill]] %s1871_s8  ;;  %s1522_s13 = smov [#allocation7]  }
  0x10   : > { %s1873_s9 = scalar_select %p1612_p8, 1, 0 }
  0x11   : > { %p1256_p9 = pneg %p1612_p8  ;;  %s236_s14 = sshll.u32 %s1522_s13, 4  ;;  %s1627_s14 = int_to_ptr.vmem [resolvable:$true] %s236_s14 }
  0x12   : > { %s1523_s15 = smov [#allocation8]   ;;  %s1331_s19 = scalar_lea.hbm %s1859_s1, 6144 }
  0x13   : > { %p1623_p11 = pnand %p1256_p9, %p1866_p1  ;;  %s1629_s16 = sshll.u32 %s1523_s15, 4  ;;  %s253_s16 = int_to_ptr.vmem [resolvable:$true] %s1629_s16 }
  0x14   : > { %p1332_p12 = scmp.ne.s32.totalorder %s1859_s1, %s1331_s19  ;;  %p1338_p5 = scmp.lt.u32.totalorder %s1331_s19, %s1859_s1 }
  0x15   : > { %p1639_p13 = pneg %p1623_p11 }
  0x17   : > { %p1334_p0 = pnand %p1639_p13, %p1332_p12 }
  0x19   : > { %p1335_p3 = pneg %p1334_p0 }
  0x1b   : > { %p1340_p7 = pnand %p1338_p5, %p1335_p3 }
  0x1d   : > { %1343 = shalt.err (!%p1340_p7)
}
  0x1e   : > { %s1344_s10 = scalar_lea.vmem %s1616_s11, 6144  ;;  %p1352_p2 = scmp.lt.s32.totalorder %s1616_s11, %s1616_s11 }
  0x1f   : > { %p1345_p9 = scmp.ne.s32.totalorder %s1616_s11, %s1344_s10  ;;  %p1353_p6 = scmp.lt.s32.totalorder %s1344_s10, %s1344_s10 }
  0x21   : > { %p1347_p10 = pnand %p1345_p9, %p1639_p13  ;;  %p1354_p12 = por %p1353_p6, %p1352_p2 }
  0x23   : > { %p1348_p1 = pneg %p1347_p10 }
  0x25   : > { %p1355_p0 = pnand %p1354_p12, %p1348_p1 }
  0x27   : > { %1358 = shalt.err (!%p1355_p0)
}
  0x28   : > { %s1524_s13 = smov 128   ;;  %s1525_s15 = smov 8  }
  0x29   : > { %1259 = dma.hbm_to_vmem [thread:$0]  (!%p1623_p11), %s1859_s1, 6144, %s1616_s11, [#allocation6], %s1524_s13, %s1524_s13, %s1525_s15  }
  0x2a   : > { %s1359_s21 = scalar_lea.hbm %s1861_s3, 2048 }
  0x2b   : > { %p1360_p1 = scmp.ne.s32.totalorder %s1861_s3, %s1359_s21  ;;  %p1366_p10 = scmp.lt.u32.totalorder %s1359_s21, %s1861_s3 }
  0x2d   : > { %p1362_p2 = pnand %p1360_p1, %p1639_p13 }
  0x2f   : > { %p1363_p6 = pneg %p1362_p2 }
  0x31   : > { %p1368_p3 = pnand %p1366_p10, %p1363_p6 }
  0x33   : > { %1371 = shalt.err (!%p1368_p3)
}
  0x34   : > { %s1372_s11 = scalar_lea.vmem %s1627_s14, 2048  ;;  %p1380_p12 = scmp.lt.s32.totalorder %s1627_s14, %s1627_s14 }
  0x35   : > { %p1373_p5 = scmp.ne.s32.totalorder %s1627_s14, %s1372_s11  ;;  %p1381_p0 = scmp.lt.s32.totalorder %s1372_s11, %s1372_s11 }
  0x37   : > { %p1375_p7 = pnand %p1373_p5, %p1639_p13  ;;  %p1382_p1 = por %p1381_p0, %p1380_p12 }
  0x39   : > { %p1376_p9 = pneg %p1375_p7 }
  0x3b   : > { %p1383_p2 = pnand %p1382_p1, %p1376_p9 }
  0x3d   : > { %1386 = shalt.err (!%p1383_p2)
}
  0x3e   : > { %1262 = dma.hbm_to_vmem [thread:$0]  (!%p1623_p11), %s1861_s3, 2048, %s1627_s14, [#allocation6], %s1524_s13, %s1524_s13, %s1525_s15  }
  0x3f   : > { %s1387_s20 = scalar_lea.hbm %s1863_s5, 2048 }
  0x40   : > { %p1388_p6 = scmp.ne.s32.totalorder %s1863_s5, %s1387_s20  ;;  %p1394_p5 = scmp.lt.u32.totalorder %s1387_s20, %s1863_s5 }
  0x42   : > { %p1390_p10 = pnand %p1388_p6, %p1639_p13 }
  0x44   : > { %p1391_p3 = pneg %p1390_p10 }
  0x46   : > { %p1396_p7 = pnand %p1394_p5, %p1391_p3 }
  0x48   : > { %1399 = shalt.err (!%p1396_p7)
}
  0x49   : > { %s1400_s11 = scalar_lea.vmem %s253_s16, 2048  ;;  %p1408_p1 = scmp.lt.s32.totalorder %s253_s16, %s253_s16 }
  0x4a   : > { %p1401_p9 = scmp.ne.s32.totalorder %s253_s16, %s1400_s11  ;;  %p1409_p2 = scmp.lt.s32.totalorder %s1400_s11, %s1400_s11 }
  0x4c   : > { %p1403_p12 = pnand %p1401_p9, %p1639_p13  ;;  %p1410_p4 = por %p1409_p2, %p1408_p1 }
  0x4e   : > { %p1404_p0 = pneg %p1403_p12 }
  0x50   : > { %p1411_p8 = pnand %p1410_p4, %p1404_p0 }
  0x52   : > { %1414 = shalt.err (!%p1411_p8)
}
  0x53   : > { %1265 = dma.hbm_to_vmem [thread:$0]  (!%p1623_p11), %s1863_s5, 2048, %s253_s16, [#allocation9], %s1524_s13, %s1524_s13, %s1525_s15  }
  0x54   : > { %s1712_s22 = sadd.s32 1, %s1519_s27   ;;  %s32_s17 = sadd.s32 1, %s1515_s26 }
  0x55   : > { %s29_s12 = ssub.s32 %s1519_s27, %s1712_s22  ;;  %p39_p8 = scmp.ne.s32.totalorder %s1515_s26, %s1511_s25 }
  0x56   : > { %p30_p4 = scmp.eq.s32.totalorder %s29_s12, 0  ;;  %p40_p13 = scmp.eq.s32.totalorder %s1519_s27, 0 }
  0x57   : > { %p1277_p6 = scmp.lt.s32.totalorder %s1519_s27, 2  ;;  %p1876_p3 = scmp.eq.s32.totalorder %s1593_s28, 1 }
  0x58   : > { %s1722_s18 = scalar_select %p30_p4, %s1515_s26, %s32_s17  }
  0x59   : > { %p41_p10 = por %p40_p13, %p39_p8  ;;  %p1726_p5 = por %p1876_p3, %p39_p8 }
  0x5a   : > { %s269_s20 = sand.u32 1, %s1515_s26   ;;  %s1238_s21 = smul.u32 768, %s1519_s27 }
  0x5b   : > { %s1237_s16 = smul.u32 48, %s269_s20  ;;  %p1737_p11 = pnand %p1277_p6, %p41_p10 }
  0x5c   : > { %s1735_s23 = scalar_lea.hbm %s1858_s0, %s1238_s21  ;;  %s1743_s14 = scalar_lea.sflag [#allocation3], %s269_s20 }
  0x5d   : > { %s273_s10 = scalar_lea.vmem [#allocation2], %s1237_s16  ;;  %s1415_s8 = scalar_lea.hbm %s1735_s23, 768 }
  0x5e   : > { %s281_s11 = sshll.u32 %s273_s10, 4  ;;  %p1416_p7 = scmp.ne.s32.totalorder %s1735_s23, %s1415_s8  ;;  %s1741_s11 = int_to_ptr.vmem [resolvable:$true] %s281_s11 }
  0x5f   : > { %p1417_p9 = pneg %p1737_p11  ;;  %s1420_s21 = scalar_lea.hbm %s1858_s0, 1536 }
  0x60   : > { %p1421_p1 = scmp.lt.u32.totalorder %s1735_s23, %s1858_s0  ;;  %p1422_p2 = scmp.lt.u32.totalorder %s1420_s21, %s1415_s8 }
  0x61   : > { %p1418_p12 = pnand %p1417_p9, %p1416_p7  ;;  %p1424_p8 = scmp.lt.u32.totalorder %s1415_s8, %s1735_s23 }
  0x62   : > { %p1423_p4 = por %p1422_p2, %p1421_p1 }
  0x63   : > { %p1419_p0 = pneg %p1418_p12 }
  0x64   : > { %p1425_p13 = por %p1424_p8, %p1423_p4 }
  0x66   : > { %p1426_p6 = pnand %p1425_p13, %p1419_p0 }
  0x68   : > { %1429 = shalt.err (!%p1426_p6)
}
  0x69   : > { %s1430_s20 = scalar_lea.vmem %s1741_s11, 768  ;;  %s1526_s16 = smov [#allocation2]  }
  0x6a   : > { %p1431_p10 = scmp.ne.s32.totalorder %s1741_s11, %s1430_s20  ;;  %s1435_s10 = sshll.u32 %s1526_s16, 4  ;;  %s1436_s10 = int_to_ptr.vmem [resolvable:$false] %s1435_s10 }
  0x6b   : > { %s1437_s12 = scalar_lea.vmem %s1436_s10, 1536  ;;  %p1438_p12 = scmp.lt.s32.totalorder %s1741_s11, %s1436_s10 }
  0x6c   : > { %p1433_p3 = pnand %p1431_p10, %p1417_p9  ;;  %p1439_p1 = scmp.lt.s32.totalorder %s1437_s12, %s1430_s20 }
  0x6e   : > { %p1434_p7 = pneg %p1433_p3  ;;  %p1440_p2 = por %p1439_p1, %p1438_p12 }
  0x70   : > { %p1441_p4 = pnand %p1440_p2, %p1434_p7 }
  0x72   : > { %1444 = shalt.err (!%p1441_p4)
}
  0x73   : > { %s1527_s8 = smov 384   ;;  %s1528_s17 = smov 24  }
  0x74   : > { %1269 = dma.hbm_to_vmem [thread:$0]  (!%p1737_p11), %s1735_s23, 768, %s1741_s11, %s1743_s14, %s1527_s8, %s1527_s8, %s1528_s17  }
  0x75   : > { %p1879_p9 = scmp.ne.s32.totalorder %s1873_s9, 0 }
  0x76   : > { %s1774_s21 = sand.u32 (!%p1879_p9), 1, %s1511_s25   ;;  %p1880_p0 = scmp.ne.s32.totalorder (!%p1879_p9), %s1870_s30, 0 }
  0x77   : > { %293 = sbr.rel (%p1879_p9) target bundleno = 872 (0x368), region = 48  ;;  %s296_s15 = scalar_lea.sflag (!%p1879_p9), [#allocation3], %s1774_s21 }
  0x78   : > { %s1239_s13 = smul.u32 (!%p1879_p9), 48, %s1774_s21 }
  0x7a   : > { %s1778_s20 = scalar_lea.vmem (!%p1879_p9), [#allocation2], %s1239_s13 }
  0x7e   : > { %1490 = dma.done.wait (%p1880_p0), %s296_s15, 768  }
  0x7f   : > { %1492 = vsyncadd (%p1880_p0), %s296_s15, 4294966528  ;;  %p1881_p11 = scmp.eq.s32.totalorder %s1593_s28, 0 }
  0x81   : > { %1494 = dma.done.wait (%p1881_p11), [#allocation6], 8192   ;;  %p1882_p8 = pmov %p1881_p11 }
  0x83   : > { %1496 = vsyncadd (%p1882_p8), [#allocation6], 4294959104  ;;  %p1883_p13 = pmov %p1882_p8 }
  0x84   : > { %p1884_p6 = pmov %p1882_p8 }
  0x85   : > { %1498 = dma.done.wait (%p1883_p13), [#allocation9], 2048  }
  0x86   : > { %1500 = vsyncadd (%p1884_p6), [#allocation9], 4294965248  ;;  %v366_v0 = vld [vmem:[#allocation5 + $0x80] sm:$0xff]  ;;  %v367_v1 = vld [vmem:[#allocation5 + $0x88] sm:$0xff]  ;;  %s902_s11 = sshll.u32 %s1774_s21, 4  ;;  %s911_s8 = sshll.u32 %s1593_s28, 8 }
  0x87   : > { %v350_v2 = vld [vmem:[#allocation5] sm:$0xff]  ;;  %v1109_v3 = vpack.c.bf16 %v367_v1, %v366_v0  ;;  %v351_v4 = vld [vmem:[#allocation5 + $0x8] sm:$0xff]  ;;  %v368_v5 = vld [vmem:[#allocation5 + $0x90] sm:$0xff]  ;;  %s341_s14 = scalar_lea.vmem [#allocation10], %s902_s11  ;;  %s1814_s15 = scalar_lea.hbm %s1865_s7, %s911_s8 }
  0x88   : > { %v369_v6 = vld [vmem:[#allocation5 + $0x98] sm:$0xff]  ;;  %v1111_v7 = vpack.c.bf16 %v351_v4, %v350_v2  ;;  %v382_v9 = vld [vmem:[#allocation5 + $0x100] sm:$0xff]  ;;  %v383_v10 = vld [vmem:[#allocation5 + $0x108] sm:$0xff]  ;;  %s787_s16 = sshll.u32 %s341_s14, 4  ;;  %s1529_s28 = smov [#allocation10]   ;;  %s1809_s16 = int_to_ptr.vmem [resolvable:$true] %s787_s16 }
  0x89   : > { %v1113_v8 = vpack.c.bf16 %v369_v6, %v368_v5  ;;  %v352_v11 = vld [vmem:[#allocation5 + $0x10] sm:$0xff]  ;;  %1110 = vmatprep.subr.bf16.mxu0 %v1109_v3  ;;  %v1141_v12 = vpack.c.bf16 %v383_v10, %v382_v9  ;;  %v353_v13 = vld [vmem:[#allocation5 + $0x18] sm:$0xff]  ;;  %v370_v14 = vld [vmem:[#allocation5 + $0xa0] sm:$0xff]  ;;  %s1445_s30 = scalar_lea.vmem %s1809_s16, 256  ;;  %s1449_s9 = sshll.u32 %s1529_s28, 4  ;;  %s1450_s9 = int_to_ptr.vmem [resolvable:$false] %s1449_s9 }
  0x8a   : > { %v371_v15 = vld [vmem:[#allocation5 + $0xa8] sm:$0xff]  ;;  %1112 = vmatpush3.bf16.msra.mxu0 %v1111_v7  ;;  %v1115_v16 = vpack.c.bf16 %v353_v13, %v352_v11  ;;  %v384_v17 = vld [vmem:[#allocation5 + $0x110] sm:$0xff]  ;;  %v385_v18 = vld [vmem:[#allocation5 + $0x118] sm:$0xff]  ;;  %p1446_p10 = scmp.ne.s32.totalorder %s1809_s16, %s1445_s30  ;;  %s1451_s23 = scalar_lea.vmem %s1450_s9, 512 }
  0x8b   : > { %1114 = vmatprep.subr.bf16.mxu0 %v1113_v8  ;;  %1142 = vmatprep.subr.bf16.mxu1 %v1141_v12  ;;  %v1117_v19 = vpack.c.bf16 %v371_v15, %v370_v14  ;;  %v1145_v20 = vpack.c.bf16 %v385_v18, %v384_v17  ;;  %v354_v21 = vld [vmem:[#allocation5 + $0x20] sm:$0xff]  ;;  %v355_v22 = vld [vmem:[#allocation5 + $0x28] sm:$0xff]  ;;  %v372_v23 = vld [vmem:[#allocation5 + $0xb0] sm:$0xff]  ;;  %p1452_p12 = scmp.lt.s32.totalorder %s1809_s16, %s1450_s9  ;;  %p1453_p1 = scmp.lt.s32.totalorder %s1451_s23, %s1445_s30 }
  0x8c   : > { %1144 = vmatpush3.bf16.msra.mxu1 %v1141_v12  ;;  %v373_v24 = vld [vmem:[#allocation5 + $0xb8] sm:$0xff]  ;;  %v386_v25 = vld [vmem:[#allocation5 + $0x120] sm:$0xff]  ;;  %v387_v26 = vld [vmem:[#allocation5 + $0x128] sm:$0xff]  ;;  %v1119_v28 = vpack.c.bf16 %v355_v22, %v354_v21  ;;  %p1447_p3 = pnand %p1446_p10, %p1726_p5 }
  0x8d   : > { %1146 = vmatprep.subr.bf16.mxu1 %v1145_v20  ;;  %v1149_v27 = vpack.c.bf16 %v387_v26, %v386_v25  ;;  %v388_v29 = vld [vmem:[#allocation5 + $0x130] sm:$0xff]  ;;  %v389_v30 = vld [vmem:[#allocation5 + $0x138] sm:$0xff]  ;;  %v1121_v31 = vpack.c.bf16 %v373_v24, %v372_v23  ;;  %v374_v34 = vld [vmem:[#allocation5 + $0xc0] sm:$0xff]  ;;  %p1454_p2 = por %p1453_p1, %p1452_p12 }
  0x8e   : > { %1116 = vmatpush3.bf16.msra.mxu0 %v1115_v16  ;;  %v356_v32 = vld [vmem:[#allocation5 + $0x30] sm:$0xff]  ;;  %v357_v33 = vld [vmem:[#allocation5 + $0x38] sm:$0xff]  ;;  %v375_v35 = vld [vmem:[#allocation5 + $0xc8] sm:$0xff]  ;;  %v1153_v36 = vpack.c.bf16 %v389_v30, %v388_v29  ;;  %p1448_p7 = pneg %p1447_p3 }
  0x8f   : > { %1118 = vmatprep.subr.bf16.mxu0 %v1117_v19  ;;  %v1123_v37 = vpack.c.bf16 %v357_v33, %v356_v32  ;;  %v390_v38 = vld [vmem:[#allocation5 + $0x140] sm:$0xff]  ;;  %v391_v39 = vld [vmem:[#allocation5 + $0x148] sm:$0xff]  ;;  %v1125_v40 = vpack.c.bf16 %v375_v35, %v374_v34  ;;  %v376_v43 = vld [vmem:[#allocation5 + $0xd0] sm:$0xff] }
  0x90   : > { %1148 = vmatpush3.bf16.msra.mxu1 %v1145_v20  ;;  %v358_v41 = vld [vmem:[#allocation5 + $0x40] sm:$0xff]  ;;  %v359_v42 = vld [vmem:[#allocation5 + $0x48] sm:$0xff]  ;;  %v377_v44 = vld [vmem:[#allocation5 + $0xd8] sm:$0xff]  ;;  %v1157_v45 = vpack.c.bf16 %v391_v39, %v390_v38  ;;  %p1455_p4 = pnand %p1454_p2, %p1448_p7 }
  0x91   : > { %1150 = vmatprep.subr.bf16.mxu1 %v1149_v27  ;;  %v345_v46 = vld [vmem:[%s1778_s20 + $0x8] sm:$0xff]  ;;  %v1127_v47 = vpack.c.bf16 %v359_v42, %v358_v41  ;;  %v392_v48 = vld [vmem:[#allocation5 + $0x150] sm:$0xff]  ;;  %v1129_v50 = vpack.c.bf16 %v377_v44, %v376_v43  ;;  %v378_v54 = vld [vmem:[#allocation5 + $0xe0] sm:$0xff] }
  0x92   : > { %1120 = vmatpush3.bf16.msra.mxu0 %v1119_v28  ;;  %v393_v49 = vld [vmem:[#allocation5 + $0x158] sm:$0xff]  ;;  %469 = vmatprep.mubr.f32.mxu0 %v345_v46  ;;  %v360_v51 = vld [vmem:[#allocation5 + $0x50] sm:$0xff]  ;;  %v379_v55 = vld [vmem:[#allocation5 + $0xe8] sm:$0xff] }
  0x93   : > { %1122 = vmatprep.subr.bf16.mxu0 %v1121_v31  ;;  %v361_v52 = vld [vmem:[#allocation5 + $0x58] sm:$0xff]  ;;  %v346_v53 = vld [vmem:[%s1778_s20 + $0x10] sm:$0xff]  ;;  %v1161_v56 = vpack.c.bf16 %v393_v49, %v392_v48  ;;  %v395_v59 = vld [vmem:[#allocation5 + $0x168] sm:$0xff]  ;;  %v1133_v60 = vpack.c.bf16 %v379_v55, %v378_v54 }
  0x94   : > { %1152 = vmatpush3.bf16.msra.mxu1 %v1149_v27  ;;  %1036 = vmatprep.mubr.f32.mxu1 %v346_v53  ;;  %v1131_v57 = vpack.c.bf16 %v361_v52, %v360_v51  ;;  %v394_v58 = vld [vmem:[#allocation5 + $0x160] sm:$0xff]  ;;  %v363_v62 = vld [vmem:[#allocation5 + $0x68] sm:$0xff]  ;;  %v380_v63 = vld [vmem:[#allocation5 + $0xf0] sm:$0xff] }
  0x95   : > { %1154 = vmatprep.subr.bf16.mxu1 %v1153_v36  ;;  %v362_v61 = vld [vmem:[#allocation5 + $0x60] sm:$0xff]  ;;  %v381_v0 = vld [vmem:[#allocation5 + $0xf8] sm:$0xff]  ;;  %v1165_v1 = vpack.c.bf16 %v395_v59, %v394_v58  ;;  %v396_v3 = vld [vmem:[#allocation5 + $0x170] sm:$0xff] }
  0x96   : > { %1124 = vmatpush3.bf16.msra.mxu0 %v1123_v37  ;;  %v1135_v2 = vpack.c.bf16 %v363_v62, %v362_v61  ;;  %v397_v4 = vld [vmem:[#allocation5 + $0x178] sm:$0xff]  ;;  %v1137_v5 = vpack.c.bf16 %v381_v0, %v380_v63  ;;  %v364_v6 = vld [vmem:[#allocation5 + $0x70] sm:$0xff]  ;;  %v565_v8 = vld [vmem:[#allocation7] sm:$0xff] }
  0x97   : > { %1126 = vmatprep.subr.bf16.mxu0 %v1125_v40  ;;  %v365_v7 = vld [vmem:[#allocation5 + $0x78] sm:$0xff]  ;;  %v566_v9 = vld [vmem:[#allocation7 + $0x8] sm:$0xff]  ;;  %v1169_v10 = vpack.c.bf16 %v397_v4, %v396_v3  ;;  %v344_v13 = vld [vmem:[%s1778_s20] sm:$0xff] }
  0x98   : > { %1156 = vmatpush3.bf16.msra.mxu1 %v1153_v36  ;;  %v1139_v11 = vpack.c.bf16 %v365_v7, %v364_v6  ;;  %v1173_v12 = vpack.c.bf16 %v566_v9, %v565_v8  ;;  %v348_v14 = vld [vmem:[%s1778_s20 + $0x20] sm:$0xff]  ;;  %v349_v15 = vld [vmem:[%s1778_s20 + $0x28] sm:$0xff]  ;;  %v347_v16 = vld [vmem:[%s1778_s20 + $0x18] sm:$0xff]  ;;  %s774_s20 = scalar_lea.sflag [#allocation4], %s1774_s21 }
  0x99   : > { %1158 = vmatprep.subr.bf16.mxu1 %v1157_v45  ;;  %v567_v17 = vld [vmem:[#allocation7 + $0x10] sm:$0xff]  ;;  %v568_v18 = vld [vmem:[#allocation7 + $0x18] sm:$0xff]  ;;  %v569_v20 = vld [vmem:[#allocation7 + $0x20] sm:$0xff] }
  0x9a   : > { %1128 = vmatpush3.bf16.msra.mxu0 %v1127_v47  ;;  %v1177_v19 = vpack.c.bf16 %v568_v18, %v567_v17  ;;  %v570_v21 = vld [vmem:[#allocation7 + $0x28] sm:$0xff]  ;;  %v571_v23 = vld [vmem:[#allocation7 + $0x30] sm:$0xff]  ;;  %v572_v24 = vld [vmem:[#allocation7 + $0x38] sm:$0xff] }
  0x9b   : > { %1130 = vmatprep.subr.bf16.mxu0 %v1129_v50  ;;  %v1181_v22 = vpack.c.bf16 %v570_v21, %v569_v20  ;;  %v1185_v25 = vpack.c.bf16 %v572_v24, %v571_v23  ;;  %v573_v26 = vld [vmem:[#allocation7 + $0x40] sm:$0xff]  ;;  %v574_v27 = vld [vmem:[#allocation7 + $0x48] sm:$0xff]  ;;  %v575_v29 = vld [vmem:[#allocation7 + $0x50] sm:$0xff] }
  0x9c   : > { %1160 = vmatpush3.bf16.msra.mxu1 %v1157_v45  ;;  %v1189_v28 = vpack.c.bf16 %v574_v27, %v573_v26  ;;  %v576_v30 = vld [vmem:[#allocation7 + $0x58] sm:$0xff]  ;;  %v577_v32 = vld [vmem:[#allocation7 + $0x60] sm:$0xff]  ;;  %v578_v33 = vld [vmem:[#allocation7 + $0x68] sm:$0xff] }
  0x9d   : > { %1162 = vmatprep.subr.bf16.mxu1 %v1161_v56  ;;  %v1193_v31 = vpack.c.bf16 %v576_v30, %v575_v29  ;;  %v1197_v34 = vpack.c.bf16 %v578_v33, %v577_v32  ;;  %v579_v35 = vld [vmem:[#allocation7 + $0x70] sm:$0xff]  ;;  %v580_v36 = vld [vmem:[#allocation7 + $0x78] sm:$0xff]  ;;  %v673_v38 = vld [vmem:[#allocation8] sm:$0xff] }
  0x9e   : > { %1132 = vmatpush3.bf16.msra.mxu0 %v1131_v57  ;;  %v1201_v37 = vpack.c.bf16 %v580_v36, %v579_v35  ;;  %v674_v39 = vld [vmem:[#allocation8 + $0x8] sm:$0xff]  ;;  %v675_v40 = vld [vmem:[#allocation8 + $0x10] sm:$0xff]  ;;  %v676_v42 = vld [vmem:[#allocation8 + $0x18] sm:$0xff] }
  0x9f   : > { %1134 = vmatprep.subr.bf16.mxu0 %v1133_v60  ;;  %v1205_v41 = vpack.c.bf16 %v674_v39, %v673_v38  ;;  %v1209_v43 = vpack.c.bf16 %v676_v42, %v675_v40  ;;  %v677_v44 = vld [vmem:[#allocation8 + $0x20] sm:$0xff]  ;;  %v678_v45 = vld [vmem:[#allocation8 + $0x28] sm:$0xff]  ;;  %v679_v6 = vld [vmem:[#allocation8 + $0x30] sm:$0xff] }
  0xa0   : > { %1164 = vmatpush3.bf16.msra.mxu1 %v1161_v56  ;;  %v1213_v46 = vpack.c.bf16 %v678_v45, %v677_v44  ;;  %v903_v49 = vld [vmem:[%s1860_s2] ss:$0 sm:$0xff]  ;;  %v680_v7 = vld [vmem:[#allocation8 + $0x38] sm:$0xff]  ;;  %v687_v18 = vld [vmem:[#allocation8 + $0x70] sm:$0xff] }
  0xa1   : > { %1166 = vmatprep.subr.bf16.mxu1 %v1165_v1  ;;  %v1217_v8 = vpack.c.bf16 %v680_v7, %v679_v6  ;;  %v681_v9 = vld [vmem:[#allocation8 + $0x40] sm:$0xff] }
  0xa2   : > { %1136 = vmatpush3.bf16.msra.mxu0 %v1135_v2  ;;  %v904_v21 = vld [vmem:[%s1862_s4] ss:$0 sm:$0xff] }
  0xa3   : > { %1138 = vmatprep.subr.bf16.mxu0 %v1137_v5  ;;  %v905_v36 = vld [vmem:[%s1864_s6] ss:$0 sm:$0xff] }
  0xa4   : > { %1168 = vmatpush3.bf16.msra.mxu1 %v1165_v1 }
  0xa5   : > { %1170 = vmatprep.subr.bf16.mxu1 %v1169_v10 }
  0xa6   : > { %1140 = vmatpush3.bf16.msra.mxu0 %v1139_v11 }
  0xa7   : > { %1174 = vmatprep.subr.bf16.mxu0 %v1173_v12 }
  0xa8   : > { %1172 = vmatpush3.bf16.msra.mxu1 %v1169_v10  ;;  %v682_v10 = vld [vmem:[#allocation8 + $0x48] sm:$0xff] }
  0xa9   : > { %470 = vmatmul.mubr.f32.vlgmr.msra.gmra.mrb[0].mxu0 %v344_v13  ;;  %1206 = vmatprep.subr.bf16.mxu1 %v1205_v41  ;;  %v1221_v11 = vpack.c.bf16 %v682_v10, %v681_v9  ;;  %v684_v13 = vld [vmem:[#allocation8 + $0x58] sm:$0xff] }
  0xaa   : > { %474 = vmatprep.mubr.f32.mxu0 %v348_v14  ;;  %1176 = vmatpush3.bf16.msra.mxu0 %v1173_v12  ;;  %v683_v12 = vld [vmem:[#allocation8 + $0x50] sm:$0xff] }
  0xab   : > { %1037 = vmatmul.mubr.f32.vlgmr.msra.gmra.mrb[0].mxu1 %v349_v15  ;;  %1178 = vmatprep.subr.bf16.mxu0 %v1177_v19  ;;  %v1225_v14 = vpack.c.bf16 %v684_v13, %v683_v12  ;;  %v685_v15 = vld [vmem:[#allocation8 + $0x60] sm:$0xff] }
  0xac   : > { %1208 = vmatpush3.bf16.msra.mxu1 %v1205_v41 }
  0xad   : > { %475 = vmatmul.mubr.f32.gmra.mrb[2].mxu0 %v347_v16  ;;  %1210 = vmatprep.subr.bf16.mxu1 %v1209_v43  ;;  %v686_v16 = vld [vmem:[#allocation8 + $0x68] sm:$0xff] }
  0xae   : > { %1180 = vmatpush3.bf16.msra.mxu0 %v1177_v19  ;;  %v1229_v17 = vpack.c.bf16 %v686_v16, %v685_v15  ;;  %v688_v19 = vld [vmem:[#allocation8 + $0x78] sm:$0xff] }
  0xaf   : > { %1182 = vmatprep.subr.bf16.mxu0 %v1181_v22  ;;  %v1233_v20 = vpack.c.bf16 %v688_v19, %v687_v18 }
  0xb0   : > { %1212 = vmatpush3.bf16.msra.mxu1 %v1209_v43 }
  0xb1   : > { %1214 = vmatprep.subr.bf16.mxu1 %v1213_v46 }
  0xb2   : > { %1184 = vmatpush3.bf16.msra.mxu0 %v1181_v22 }
  0xb3   : > { %1186 = vmatprep.subr.bf16.mxu0 %v1185_v25 }
  0xb4   : > { %1216 = vmatpush3.bf16.msra.mxu1 %v1213_v46 }
  0xb5   : > { %1218 = vmatprep.subr.bf16.mxu1 %v1217_v8 }
  0xb6   : > { %1188 = vmatpush3.bf16.msra.mxu0 %v1185_v25 }
  0xb7   : > { %1190 = vmatprep.subr.bf16.mxu0 %v1189_v28 }
  0xb8   : > { %1220 = vmatpush3.bf16.msra.mxu1 %v1217_v8 }
  0xb9   : > { %1222 = vmatprep.subr.bf16.mxu1 %v1221_v11 }
  0xba   : > { %1192 = vmatpush3.bf16.msra.mxu0 %v1189_v28 }
  0xbb   : > { %1194 = vmatprep.subr.bf16.mxu0 %v1193_v31 }
  0xbc   : > { %1224 = vmatpush3.bf16.msra.mxu1 %v1221_v11 }
  0xbd   : > { %1226 = vmatprep.subr.bf16.mxu1 %v1225_v14 }
  0xbe   : > { %1196 = vmatpush3.bf16.msra.mxu0 %v1193_v31 }
  0xbf   : > { %1198 = vmatprep.subr.bf16.mxu0 %v1197_v34 }
  0xc0   : > { %1228 = vmatpush3.bf16.msra.mxu1 %v1225_v14 }
  0xc1   : > { %1230 = vmatprep.subr.bf16.mxu1 %v1229_v17 }
  0xc2   : > { %1200 = vmatpush3.bf16.msra.mxu0 %v1197_v34 }
  0xc3   : > { %1202 = vmatprep.subr.bf16.mxu0 %v1201_v37 }
  0xc4   : > { %1232 = vmatpush3.bf16.msra.mxu1 %v1229_v17 }
  0xc5   : > { %1234 = vmatprep.subr.bf16.mxu1 %v1233_v20 }
  0xc6   : > { %1204 = vmatpush3.bf16.msra.mxu0 %v1201_v37 }
  0xc8   : > { %1236 = vmatpush3.bf16.msra.mxu1 %v1233_v20 }
 0x17c   : > { %v944_v47 = vpop.f32.mrb[0].mxu0 }
 0x17d   : > { %v945_v48 = vpop.f32.mrb[1].mxu0 }
 0x17e   : > { %v946_v50 = vadd.f32 %v945_v48, %v944_v47  ;;  %v1038_v51 = vpop.f32.mrb[0].mxu1 }
 0x17f   : > { %v546_v52 = vpop.f32.mrb[1].mxu1 }
 0x180   : > { %v947_v53 = vpop.f32.mrb[2].mxu0  ;;  %v472_v54 = vadd.f32 %v946_v50, %v903_v49 }
 0x181   : > { %v948_v55 = vpop.f32.mrb[3].mxu0 }
 0x182   : > { %v949_v56 = vadd.f32 %v948_v55, %v947_v53  ;;  %v547_v57 = vadd.f32 %v546_v52, %v472_v54 }
 0x184   : > { %v477_v58 = vadd.f32 %v949_v56, %v903_v49  ;;  %v557_v59 = vmul.f32 0.70710677, %v547_v57  ;;  %v555_v63 = vmul.f32 0.5, %v547_v57 }
 0x186   : > { %v552_v60 = vadd.f32 %v1038_v51, %v477_v58  ;;  %1323 = verf.f32 %v557_v59 }
 0x188   : > { %v558_v61 = vmul.f32 0.70710677, %v552_v60  ;;  %v556_v3 = vmul.f32 0.5, %v552_v60 }
 0x18a   : > { %1325 = verf.f32 %v558_v61 }
 0x190   : > { %v1324_v62 = vpop.eup %1323 }
 0x191   : > { %v561_v0 = vadd.f32 1.0, %v1324_v62 }
 0x193   : > { %v563_v1 = vmul.f32 %v561_v0, %v555_v63 }
 0x194   : > { %v1326_v2 = vpop.eup %1325 }
 0x195   : > { %v562_v4 = vadd.f32 1.0, %v1326_v2  ;;  %1071 = vmatprep.mubr.f32.mxu0 %v563_v1 }
 0x197   : > { %v564_v5 = vmul.f32 %v562_v4, %v556_v3 }
 0x199   : > { %1072 = vmatmul.mubr.f32.vlgmr.msra.gmra.mrb[4].mxu0 %v564_v5 }
 0x26c   : > { %v1073_v22 = vpop.f32.mrb[4].mxu0 }
 0x26d   : > { %v660_v23 = vadd.f32 %v1073_v22, %v904_v21  ;;  %v654_v24 = vpop.f32.mrb[5].mxu0 }
 0x26e   : > { %v655_v25 = vadd.f32 %v904_v21, %v654_v24 }
 0x26f   : > { %v666_v26 = vmul.f32 0.70710677, %v660_v23  ;;  %v664_v33 = vmul.f32 0.5, %v660_v23 }
 0x270   : > { %v665_v27 = vmul.f32 0.70710677, %v655_v25  ;;  %v663_v31 = vmul.f32 0.5, %v655_v25 }
 0x271   : > { %1327 = verf.f32 %v666_v26 }
 0x272   : > { %1329 = verf.f32 %v665_v27 }
 0x27b   : > { %v1328_v28 = vpop.eup %1327 }
 0x27c   : > { %v1330_v29 = vpop.eup %1329  ;;  %v670_v30 = vadd.f32 1.0, %v1328_v28 }
 0x27d   : > { %v669_v32 = vadd.f32 1.0, %v1330_v29 }
 0x27e   : > { %v672_v35 = vmul.f32 %v670_v30, %v664_v33 }
 0x27f   : > { %v671_v34 = vmul.f32 %v669_v32, %v663_v31 }
 0x281   : > { %1106 = vmatprep.mubr.f32.mxu1 %v671_v34 }
 0x282   : > { %1107 = vmatmul.mubr.f32.vlgmr.msra.gmra.mrb[2].mxu1 %v672_v35 }
 0x355   : > { %v1108_v37 = vpop.f32.mrb[2].mxu1 }
 0x356   : > { %v768_v38 = vadd.f32 %v1108_v37, %v905_v36  ;;  %v762_v39 = vpop.f32.mrb[3].mxu1 }
 0x357   : > { %v763_v40 = vadd.f32 %v905_v36, %v762_v39 }
 0x358   : > { %772 = vst [vmem:[%s341_s14 + $0x8] sm:$0xff] %v768_v38 }
 0x359   : > { %771 = vst [vmem:[%s341_s14] sm:$0xff] %v763_v40 }
 0x35a   : > { %1458 = shalt.err (!%p1455_p4)
}
 0x35b   : > { %s1459_s29 = scalar_lea.hbm %s1814_s15, 256  ;;  %s1463_s10 = scalar_lea.hbm %s1865_s7, 512 }
 0x35c   : > { %p1460_p9 = scmp.ne.s32.totalorder %s1814_s15, %s1459_s29  ;;  %p1464_p8 = scmp.lt.u32.totalorder %s1814_s15, %s1865_s7 }
 0x35d   : > { %p1465_p13 = scmp.lt.u32.totalorder %s1463_s10, %s1459_s29  ;;  %p1467_p10 = scmp.lt.u32.totalorder %s1459_s29, %s1814_s15 }
 0x35e   : > { %p1461_p0 = pnand %p1460_p9, %p1726_p5 }
 0x35f   : > { %p1466_p6 = por %p1465_p13, %p1464_p8 }
 0x360   : > { %p1462_p11 = pneg %p1461_p0 }
 0x361   : > { %p1468_p3 = por %p1467_p10, %p1466_p6 }
 0x363   : > { %p1469_p7 = pnand %p1468_p3, %p1462_p11 }
 0x365   : > { %1472 = shalt.err (!%p1469_p7)
}
 0x366   : > { %s1530_s17 = smov 128   ;;  %s1531_s13 = smov 8  }
 0x367   : > { %1254 = dma.vmem_to_hbm [thread:$0]  (%p1726_p5), %s1809_s16, 256, %s1814_s15, %s774_s20, %s1530_s17, %s1530_s17, %s1531_s13  }
 0x368 PF: > { %s1885_s30 = sld [smem:[#allocation15_spill]]  ;;  %s802_s28 = sand.u32 1, %s1507_s24  }
 0x369   : > { %p1887_p1 = scmp.ge.s32.totalorder %s1519_s27, 2  ;;  %s803_s9 = scalar_lea.sflag [#allocation4], %s802_s28 }
 0x36e   : > { %p1886_p12 = scmp.ne.s32.totalorder %s1885_s30, 0 }
 0x370   : > { %p1271_p2 = pnand %p1887_p1, %p1886_p12 }
 0x372   : > { %1502 = dma.done.wait (!%p1271_p2), %s803_s9, 256  }
 0x373   : > { %1504 = vsyncadd (!%p1271_p2), %s803_s9, 4294967040  ;;  %p22_p4 = scmp.ge.s32.totalorder %s1712_s22, 4   ;;  %s1888_s24 = smov %s1511_s25 }
 0x374   : > { %s1889_s25 = smov %s1515_s26  ;;  %s1890_s26 = smov %s1722_s18 }
 0x375   : > { %s1891_s27 = smov %s1712_s22  ;;  %24 = sbr.rel (!%p22_p4) target bundleno = 7 (0x7), region = 105 }
 0x37c   :  { %808 = vsyncpa [#allocation3], 1 }
 0x37d   :  { %810 = vsyncpa [#allocation3 + $0x1], 1 }
 0x37e   :  { %811 = vsyncpa [#allocation6], 1 }
 0x37f   :  { %812 = vsyncpa [#allocation9], 1 }
 0x380   :  { %813 = vsyncpa [#allocation4], 1 }
 0x381   :  { %815 = vsyncpa [#allocation4 + $0x1], 1 }

</bundles_post_ra>
